<compile_context>
chip_gen: v5e
topology: v5e:2x2
jax: 0.10.0
libtpu: 0.0.40
codegen_flags: <defaults>
</compile_context>

<pallas_src>
import jax
import jax.numpy as jnp
from jax.experimental import pallas as pl
from jax.experimental.pallas import tpu as pltpu


def _se_kernel(x_ref, w1_ref, b1_ref, w2_ref, b2_ref, o_ref):
    # x_ref:  (Bt, C, HW)  native dtype (f32 or bf16)
    # w1_ref: (C, R) f32   b1_ref: (1, R) f32
    # w2_ref: (R, C) f32   b2_ref: (1, C) f32
    x = x_ref[...]                                            # (Bt, C, HW)

    # Squeeze: AdaptiveAvgPool2d(1) == mean over spatial axis.
    # Accumulate in f32 even when x is bf16.
    pooled = jnp.mean(x.astype(jnp.float32), axis=-1)         # (Bt, C)

    # Excitation MLP (tiny; compute is free here).  1x1 conv C->R + SiLU.
    h = jnp.dot(pooled, w1_ref[...],
                preferred_element_type=jnp.float32) + b1_ref[...]   # (Bt, R)
    h = h * jax.nn.sigmoid(h)                                  # SiLU
    # 1x1 conv R->C + Sigmoid.
    s = jnp.dot(h, w2_ref[...],
                preferred_element_type=jnp.float32) + b2_ref[...]   # (Bt, C)
    s = jax.nn.sigmoid(s)

    # Scale: broadcast per-channel gate over spatial; multiply in x's dtype.
    o_ref[...] = x * s[:, :, None].astype(x.dtype)


def squeeze_excitation(x_nchw, w1, b1, w2, b2, *, block_bytes=4 * 1024 * 1024):
    """x_nchw: (B, C, H, W) float dtype; w1: (R, C); b1: (R,); w2: (C, R); b2: (C,)."""
    B, C, H, W = x_nchw.shape
    R = w1.shape[0]
    HW = H * W

    # Keep x in its native dtype; NO full-tensor cast in the wrapper.
    x = x_nchw.reshape(B, C, HW)

    # Tiny gate-path params in f32, matmul-friendly orientation.
    w1_t = jnp.transpose(w1).astype(jnp.float32)   # (C, R)
    w2_t = jnp.transpose(w2).astype(jnp.float32)   # (R, C)
    b1_r = b1.reshape(1, R).astype(jnp.float32)
    b2_r = b2.reshape(1, C).astype(jnp.float32)

    # Batch-tiled grid: full (C, HW) plane per block (single HBM read of x),
    # ~4 MiB tiles so the 2x double-buffered in + out blocks fit scoped VMEM
    # on every TPU generation.
    bytes_per_row = C * HW * x.dtype.itemsize
    bt = int(max(1, min(B, block_bytes // max(1, bytes_per_row))))
    grid = (pl.cdiv(B, bt),)

    out = pl.pallas_call(
        _se_kernel,
        out_shape=jax.ShapeDtypeStruct((B, C, HW), x.dtype),
        grid=grid,
        in_specs=[
            pl.BlockSpec((bt, C, HW), lambda b: (b, 0, 0)),   # activation tile
            pl.BlockSpec((C, R), lambda b: (0, 0)),           # weights stay resident
            pl.BlockSpec((1, R), lambda b: (0, 0)),
            pl.BlockSpec((R, C), lambda b: (0, 0)),
            pl.BlockSpec((1, C), lambda b: (0, 0)),
        ],
        out_specs=pl.BlockSpec((bt, C, HW), lambda b: (b, 0, 0)),
        compiler_params=pltpu.CompilerParams(
            dimension_semantics=("parallel",),        # megacore sharding on v7x
            vmem_limit_bytes=32 * 1024 * 1024,
        ),
    )(x, w1_t, b1_r, w2_t, b2_r)

    return out.reshape(B, C, H, W)


if __name__ == "__main__":
    B, C, H, W = 2, 4, 16, 16
    reduced_dim = 2

    key = jax.random.PRNGKey(0)
    kx, k1, k2, k3, k4 = jax.random.split(key, 5)

    x = jax.random.normal(kx, (B, C, H, W), dtype=jnp.float32)
    # nn.Conv2d(C, R, 1) weight (R, C, 1, 1) -> (R, C); bias (R,)
    w1 = jax.random.normal(k1, (reduced_dim, C), dtype=jnp.float32) * 0.1
    b1 = jax.random.normal(k2, (reduced_dim,), dtype=jnp.float32) * 0.1
    # nn.Conv2d(R, C, 1) weight (C, R, 1, 1) -> (C, R); bias (C,)
    w2 = jax.random.normal(k3, (C, reduced_dim), dtype=jnp.float32) * 0.1
    b2 = jax.random.normal(k4, (C,), dtype=jnp.float32) * 0.1

    # Pure-JAX reference.
    def ref_fn(xr):
        pooled = jnp.mean(xr.astype(jnp.float32), axis=(2, 3))          # (B, C)
        h = pooled @ w1.T + b1
        h = h * jax.nn.sigmoid(h)
        s = jax.nn.sigmoid(h @ w2.T + b2)                               # (B, C)
        return xr.astype(jnp.float32) * s[:, :, None, None]

    # f32 path.
    out = squeeze_excitation(x, w1, b1, w2, b2)
    jax.block_until_ready(out)
    assert jnp.allclose(out, ref_fn(x), atol=1e-5, rtol=1e-5)

    # bf16 activation path (native dtype flows through; halves HBM traffic).
    xb = x.astype(jnp.bfloat16)
    out_b = squeeze_excitation(xb, w1, b1, w2, b2)
    jax.block_until_ready(out_b)
    assert out_b.dtype == jnp.bfloat16
    assert jnp.allclose(out_b.astype(jnp.float32), ref_fn(xb),
                        atol=5e-2, rtol=5e-2)

    print("KERNEL_OK")
</pallas_src>

<mosaic_0001>
module attributes {stable_mosaic.version = 11 : i64} {
  func.func @_se_kernel(%arg0: i32, %arg1: memref<2x4x256xf32, #tpu.memory_space<vmem>>, %arg2: memref<4x2xf32, #tpu.memory_space<vmem>>, %arg3: memref<1x2xf32, #tpu.memory_space<vmem>>, %arg4: memref<2x4xf32, #tpu.memory_space<vmem>>, %arg5: memref<1x4xf32, #tpu.memory_space<vmem>>, %arg6: memref<2x4x256xf32, #tpu.memory_space<vmem>>) attributes {dimension_semantics = [#tpu.dimension_semantics<parallel>], iteration_bounds = array<i64: 1>, scalar_prefetch = 0 : i64, scratch_operands = 0 : i64, tpu.core_type = #tpu.core_type<tc>, window_params = [{transform_indices = @transform_0, window_bounds = array<i64: 2, 4, 256>}, {pipeline_mode = #tpu.pipeline_mode<synchronous>, transform_indices = @transform_1, window_bounds = array<i64: 4, 2>}, {pipeline_mode = #tpu.pipeline_mode<synchronous>, transform_indices = @transform_2, window_bounds = array<i64: 1, 2>}, {pipeline_mode = #tpu.pipeline_mode<synchronous>, transform_indices = @transform_3, window_bounds = array<i64: 2, 4>}, {pipeline_mode = #tpu.pipeline_mode<synchronous>, transform_indices = @transform_4, window_bounds = array<i64: 1, 4>}, {transform_indices = @transform_5, window_bounds = array<i64: 2, 4, 256>}]} {
    %c0 = arith.constant 0 : index
    %c0_0 = arith.constant 0 : index
    %c0_1 = arith.constant 0 : index
    %0 = vector.load %arg1[%c0, %c0_0, %c0_1] : memref<2x4x256xf32, #tpu.memory_space<vmem>>, vector<2x4x256xf32>
    %cst = arith.constant dense<0.000000e+00> : vector<2x4xf32>
    %1 = vector.multi_reduction <add>, %0, %cst [2] : vector<2x4x256xf32> to vector<2x4xf32>
    %cst_2 = arith.constant 2.560000e+02 : f32
    %2 = vector.broadcast %cst_2 : f32 to vector<2x4xf32>
    %3 = arith.divf %1, %2 : vector<2x4xf32>
    %c0_3 = arith.constant 0 : index
    %c0_4 = arith.constant 0 : index
    %4 = vector.load %arg2[%c0_3, %c0_4] : memref<4x2xf32, #tpu.memory_space<vmem>>, vector<4x2xf32>
    %cst_5 = arith.constant dense<0.000000e+00> : vector<2x2xf32>
    %5 = tpu.matmul %3, %4, %cst_5 {dimension_numbers = #tpu.dot_dimension_numbers<[1], [0], [0], [1], [0, 0, 1, 1], [], []>} : vector<2x4xf32>, vector<4x2xf32>, vector<2x2xf32> -> vector<2x2xf32>
    %c0_6 = arith.constant 0 : index
    %c0_7 = arith.constant 0 : index
    %6 = vector.load %arg3[%c0_6, %c0_7] : memref<1x2xf32, #tpu.memory_space<vmem>>, vector<1x2xf32>
    %7 = vector.broadcast %6 : vector<1x2xf32> to vector<2x2xf32>
    %8 = arith.addf %5, %7 : vector<2x2xf32>
    %9 = arith.negf %8 : vector<2x2xf32>
    %10 = math.exp %9 : vector<2x2xf32>
    %cst_8 = arith.constant 1.000000e+00 : f32
    %11 = vector.broadcast %cst_8 : f32 to vector<2x2xf32>
    %12 = arith.addf %11, %10 : vector<2x2xf32>
    %13 = arith.divf %11, %12 : vector<2x2xf32>
    %14 = arith.mulf %8, %13 : vector<2x2xf32>
    %c0_9 = arith.constant 0 : index
    %c0_10 = arith.constant 0 : index
    %15 = vector.load %arg4[%c0_9, %c0_10] : memref<2x4xf32, #tpu.memory_space<vmem>>, vector<2x4xf32>
    %cst_11 = arith.constant dense<0.000000e+00> : vector<2x4xf32>
    %16 = tpu.matmul %14, %15, %cst_11 {dimension_numbers = #tpu.dot_dimension_numbers<[1], [0], [0], [1], [0, 0, 1, 1], [], []>} : vector<2x2xf32>, vector<2x4xf32>, vector<2x4xf32> -> vector<2x4xf32>
    %c0_12 = arith.constant 0 : index
    %c0_13 = arith.constant 0 : index
    %17 = vector.load %arg5[%c0_12, %c0_13] : memref<1x4xf32, #tpu.memory_space<vmem>>, vector<1x4xf32>
    %18 = vector.broadcast %17 : vector<1x4xf32> to vector<2x4xf32>
    %19 = arith.addf %16, %18 : vector<2x4xf32>
    %20 = arith.negf %19 : vector<2x4xf32>
    %21 = math.exp %20 : vector<2x4xf32>
    %cst_14 = arith.constant 1.000000e+00 : f32
    %22 = vector.broadcast %cst_14 : f32 to vector<2x4xf32>
    %23 = arith.addf %22, %21 : vector<2x4xf32>
    %24 = arith.divf %22, %23 : vector<2x4xf32>
    %25 = vector.shape_cast %24 : vector<2x4xf32> to vector<2x4x1xf32>
    %26 = vector.broadcast %25 : vector<2x4x1xf32> to vector<2x4x256xf32>
    %27 = arith.mulf %0, %26 : vector<2x4x256xf32>
    %c0_15 = arith.constant 0 : index
    %c0_16 = arith.constant 0 : index
    %c0_17 = arith.constant 0 : index
    %28 = vector.load %arg6[%c0_15, %c0_16, %c0_17] : memref<2x4x256xf32, #tpu.memory_space<vmem>>, vector<2x4x256xf32>
    tpu.vector_store %arg6[%c0_15, %c0_16, %c0_17], %27 {strides = array<i32>} : memref<2x4x256xf32, #tpu.memory_space<vmem>>, vector<2x4x256xf32>,
    return
  }
  func.func @transform_0(%arg0: i32) -> (i32, i32, i32) {
    %c0_i32 = arith.constant 0 : i32
    %c0_i32_0 = arith.constant 0 : i32
    %c0_i32_1 = arith.constant 0 : i32
    return %arg0, %c0_i32, %c0_i32_0 : i32, i32, i32
  }
  func.func @transform_1(%arg0: i32) -> (i32, i32) {
    %c0_i32 = arith.constant 0 : i32
    %c0_i32_0 = arith.constant 0 : i32
    %c0_i32_1 = arith.constant 0 : i32
    return %c0_i32, %c0_i32_0 : i32, i32
  }
  func.func @transform_2(%arg0: i32) -> (i32, i32) {
    %c0_i32 = arith.constant 0 : i32
    %c0_i32_0 = arith.constant 0 : i32
    %c0_i32_1 = arith.constant 0 : i32
    return %c0_i32, %c0_i32_0 : i32, i32
  }
  func.func @transform_3(%arg0: i32) -> (i32, i32) {
    %c0_i32 = arith.constant 0 : i32
    %c0_i32_0 = arith.constant 0 : i32
    %c0_i32_1 = arith.constant 0 : i32
    return %c0_i32, %c0_i32_0 : i32, i32
  }
  func.func @transform_4(%arg0: i32) -> (i32, i32) {
    %c0_i32 = arith.constant 0 : i32
    %c0_i32_0 = arith.constant 0 : i32
    %c0_i32_1 = arith.constant 0 : i32
    return %c0_i32, %c0_i32_0 : i32, i32
  }
  func.func @transform_5(%arg0: i32) -> (i32, i32, i32) {
    %c0_i32 = arith.constant 0 : i32
    %c0_i32_0 = arith.constant 0 : i32
    %c0_i32_1 = arith.constant 0 : i32
    return %arg0, %c0_i32, %c0_i32_0 : i32, i32, i32
  }
}

</mosaic_0001>

<bundles_post_ra>
// kernel: tpu_custom_call.1
= control target key start
LH: loop header
LB: loop body
LE: loop exit
PB: predicated region body
PF: predicated region fallthrough
CT: control target
= control target key end

     0   :  { %10 = vsyncpa [#allocation3], 0  ;;  %s383_s0 = inlined_call_operand.hbm [shape: f32[2,4,256], index: 0, kind: input, shape index: {}]   ;;  %s384_s1 = inlined_call_operand.vmem [shape: f32[4,2], index: 1, kind: input, shape index: {}]   ;;  %s385_s2 = inlined_call_operand.vmem [shape: f32[1,2], index: 2, kind: input, shape index: {}]   ;;  %s386_s3 = inlined_call_operand.vmem [shape: f32[2,4], index: 3, kind: input, shape index: {}]   ;;  %s387_s4 = inlined_call_operand.vmem [shape: f32[1,4], index: 4, kind: input, shape index: {}]   ;;  %s388_s5 = inlined_call_operand.hbm [shape: f32[2,4,256], index: 5, kind: output, shape index: {}]  }
   0x1   :  { %11 = vsyncpa [#allocation4], 0  ;;  %s16_s20 = sshll.u32 %s383_s0, 4  ;;  %s310_s21 = smov [#allocation2]   ;;  %s17_s20 = int_to_ptr.hbm [resolvable:$true] %s16_s20 }
   0x2   :  { %s18_s22 = sshll.u32 %s310_s21, 4  ;;  %s311_s23 = smov 128   ;;  %s19_s22 = int_to_ptr.vmem [resolvable:$true] %s18_s22 }
   0x3   :  { %s312_s24 = smov 8  }
   0x4   :  { %24 = dma.hbm_to_vmem [thread:$0]  %s17_s20, 256, %s19_s22, [#allocation3], %s311_s23, %s311_s23, %s312_s24  }
   0x5   :  { %306 = dma.done.wait [#allocation3], 256  }
   0x6   :  { %307 = vsyncadd [#allocation3], 4294967040  ;;  %v352_v0 = vld [vmem:[#allocation2] sm:$0xff]  ;;  %v354_v1 = vld [vmem:[#allocation2 + $0x8] sm:$0xff]  ;;  %vm52_vm0 = vcmask 1043456   ;;  %v313_v12 = vmov 256.0   ;;  %v79_v20 = vlaneseq }
   0x7   :  { %41 = vst [vmem:[#allocation1] ss:$2 sm:$0xff] %v352_v0  ;;  %248 = vrcp.f32 %v313_v12  ;;  %v72_v13 = vld [vmem:[%s384_s1] sm:$0xf]  ;;  %vm83_vm2 = vcmask 1041409   ;;  %vm85_vm3 = vcmask 31744  }
   0x8   :  { %45 = vst [vmem:[#allocation1 + $0x10] ss:$2 sm:$0xff] %v354_v1  ;;  %232 = vmatpush.msk.msra.mxu0 %vm52_vm0, %v72_v13  ;;  %v80_v22 = vand.u32 127, %v79_v20  ;;  %v246_v29 = vld [vmem:[%s385_s2] ss:$0 sm:$0xff]  ;;  %vm140_vm4 = vcmask 1041408  }
   0x9   :  { %v131_v30 = vld [vmem:[%s386_s3] sm:$0x3]  ;;  %vm136_vm9 = vcmask 15360   ;;  %v185_v47 = vshrl.u32 %v79_v20, 7  ;;  %s219_s7 = sshll.u32 %s388_s5, 4  ;;  %s220_s7 = int_to_ptr.hbm [resolvable:$true] %s219_s7 }
   0xa   :  { %235 = vmatpush.msk.msra.mxu1 %vm140_vm4, %v131_v30  ;;  %v247_v48 = vld [vmem:[%s387_s4] ss:$0 sm:$0xff]  ;;  %s315_s4 = smov [#allocation5]  }
   0xb   :  { %244 = vset.pattern.permute.xlu1 %v185_v47  ;;  %245 = vset.pattern.permute.xlu0 %v185_v47  ;;  %s217_s29 = sshll.u32 %s315_s4, 4  ;;  %s218_s29 = int_to_ptr.vmem [resolvable:$true] %s217_s29 }
   0xd   :  { %v249_v14 = vpop.eup %248 }
   0xe   :  { %v42_v2 = vld.sshfl [vmem:[#allocation1] sm:$0xff pattern:$0x75316420]  ;;  %v43_v3 = vld.sshfl [vmem:[#allocation1 + $0x8] sm:$0xff pattern:$0x75316420]  ;;  %vm68_vm1 = vweird.f32 %v249_v14 }
   0xf   :  { %v53_v4 = vsel %vm52_vm0, %v42_v2, 0.0  ;;  %v54_v5 = vsel %vm52_vm0, %v43_v3, 0.0  ;;  %v46_v7 = vld.sshfl [vmem:[#allocation1 + $0x10] sm:$0xff pattern:$0x75316420]  ;;  %v64_v15 = vmul.f32 256.0, %v249_v14 }
  0x10   :  { %v55_v6 = vadd.f32 %v54_v5, %v53_v4  ;;  %v47_v8 = vld.sshfl [vmem:[#allocation1 + $0x18] sm:$0xff pattern:$0x75316420]  ;;  %v58_v9 = vsel %vm52_vm0, %v46_v7, 0.0  ;;  %v314_v4 = vmov 839922192  }
  0x11   :  { %v59_v10 = vsel %vm52_vm0, %v47_v8, 0.0  ;;  %v65_v16 = vsub.f32 1.0, %v64_v15  ;;  %v200_v5 = vunpack.c.l.s4 %v314_v4 }
  0x12   :  { %56 = vadd.xlane.f32.xlu0 %v55_v6  ;;  %v60_v11 = vadd.f32 %v59_v10, %v58_v9 }
  0x13   :  { %v66_v17 = vmul.f32 %v249_v14, %v65_v16  ;;  %v201_v6 = vunpack.c.0.s8 %v200_v5 }
  0x15   :  { %v67_v18 = vadd.f32 %v249_v14, %v66_v17 }
  0x17   :  { %v69_v21 = vsel %vm68_vm1, %v249_v14, %v67_v18 }
  0x1a   :  { %61 = vadd.xlane.f32.xlu0 %v60_v11 }
  0x85   :  { %v57_v19 = vpop.xlane.xlu0 %56 }
  0x86   :  { %v70_v23 = vmul.f32 %v69_v21, %v57_v19 }
  0x88   :  { %v81_v26 = vperm.slane %v70_v23, %v80_v22 }
  0x8d   :  { %v62_v24 = vpop.xlane.xlu0 %61 }
  0x8e   :  { %v71_v25 = vmul.f32 %v69_v21, %v62_v24 }
  0x90   :  { %v82_v27 = vperm.slane %v71_v25, %v80_v22 }
  0x92   :  { %v84_v28 = vsel %vm83_vm2, %v82_v27, %v81_v26 }
  0x93   :  { %233 = vmatmul.msk.f32.vlgmr.msra.gmra.mxu0 %vm85_vm3, %v84_v28 }
 0x110   :  { %v108_v31 = vpop.f32.mrf.mxu0 }
 0x111   :  { %v109_v32 = vadd.f32 %v246_v29, %v108_v31 }
 0x113   :  { %v234_v33 = vmul.f32 -1.442695, %v109_v32 }
 0x115   :  { %250 = vpow2.f32 %v234_v33 }
 0x11b   :  { %v251_v34 = vpop.eup %250 }
 0x11c   :  { %v114_v35 = vadd.f32 1.0, %v251_v34 }
 0x11e   :  { %252 = vrcp.f32 %v114_v35  ;;  %v126_v39 = vand.u32 2147483648, %v114_v35  ;;  %v124_v41 = vand.u32 2147483647, %v114_v35  ;;  %vm120_vm6 = vweird.f32 %v114_v35 }
 0x120   :  { %v127_v43 = vor.u32 1.1754944e-38, %v126_v39  ;;  %vm125_vm8 = vcmp.eq.f32.partialorder %v124_v41, 8.507059e+37 }
 0x124   :  { %v253_v36 = vpop.eup %252 }
 0x125   :  { %v116_v37 = vmul.f32 %v253_v36, %v114_v35  ;;  %vm121_vm5 = vweird.f32 %v253_v36 }
 0x126   :  { %vm122_vm7 = vmor %vm120_vm6, %vm121_vm5 }
 0x127   :  { %v117_v38 = vsub.f32 1.0, %v116_v37 }
 0x129   :  { %v118_v40 = vmul.f32 %v253_v36, %v117_v38 }
 0x12b   :  { %v119_v42 = vadd.f32 %v253_v36, %v118_v40 }
 0x12d   :  { %v123_v44 = vsel %vm122_vm7, %v253_v36, %v119_v42 }
 0x12e   :  { %v128_v45 = vsel %vm125_vm8, %v127_v43, %v123_v44 }
 0x12f   :  { %v130_v46 = vmul.f32 %v128_v45, %v109_v32 }
 0x131   :  { %236 = vmatmul.msk.f32.vlgmr.msra.gmra.mxu1 %vm136_vm9, %v130_v46 }
 0x1ae   :  { %v161_v49 = vpop.f32.mrf.mxu1 }
 0x1af   :  { %v162_v50 = vadd.f32 %v247_v48, %v161_v49 }
 0x1b1   :  { %v237_v51 = vmul.f32 -1.442695, %v162_v50 }
 0x1b3   :  { %254 = vpow2.f32 %v237_v51 }
 0x1b9   :  { %v255_v52 = vpop.eup %254 }
 0x1ba   :  { %v167_v53 = vadd.f32 1.0, %v255_v52 }
 0x1bc   :  { %256 = vrcp.f32 %v167_v53  ;;  %v179_v57 = vand.u32 2147483648, %v167_v53  ;;  %v177_v59 = vand.u32 2147483647, %v167_v53  ;;  %vm173_vm11 = vweird.f32 %v167_v53 }
 0x1be   :  { %v180_v61 = vor.u32 1.1754944e-38, %v179_v57  ;;  %vm178_vm13 = vcmp.eq.f32.partialorder %v177_v59, 8.507059e+37 }
 0x1c2   :  { %v257_v54 = vpop.eup %256 }
 0x1c3   :  { %v169_v55 = vmul.f32 %v257_v54, %v167_v53  ;;  %vm174_vm10 = vweird.f32 %v257_v54 }
 0x1c4   :  { %vm175_vm12 = vmor %vm173_vm11, %vm174_vm10 }
 0x1c5   :  { %v170_v56 = vsub.f32 1.0, %v169_v55 }
 0x1c7   :  { %v171_v58 = vmul.f32 %v257_v54, %v170_v56 }
 0x1c9   :  { %v172_v60 = vadd.f32 %v257_v54, %v171_v58 }
 0x1cb   :  { %v176_v62 = vsel %vm175_vm12, %v257_v54, %v172_v60 }
 0x1cc   :  { %v181_v63 = vsel %vm178_vm13, %v180_v61, %v176_v62 }
 0x1cd   :  { %v183_v2 = vperm.slane %v181_v63, 0  ;;  %v190_v3 = vperm.slane %v181_v63, 1 }
 0x1cf   :  { %188 = vperm.xlu1 %244, %v183_v2  }
 0x1d7   :  { %195 = vperm.xlu1 %244, %v190_v3  }
 0x241   :  { %v189_v7 = vpop.permute.xlu1 %188 }
 0x242   :  { %v202_v8 = vperm.slane %v189_v7, %v201_v6 }
 0x244   :  { %v209_v9 = vmul.f32 %v202_v8, %v352_v0 }
 0x246   :  { %211 = vst [vmem:[#allocation5] sm:$0xff] %v209_v9 }
 0x249   :  { %v196_v10 = vpop.permute.xlu1 %195 }
 0x24a   :  { %v206_v11 = vperm.slane %v196_v10, %v201_v6 }
 0x24c   :  { %v210_v12 = vmul.f32 %v206_v11, %v354_v1 }
 0x24e   :  { %212 = vst [vmem:[#allocation5 + $0x8] sm:$0xff] %v210_v12 }
 0x24f   :  { %225 = dma.vmem_to_hbm [thread:$0]  %s218_s29, 256, %s220_s7, [#allocation4], %s311_s23, %s311_s23, %s312_s24  }
 0x250   :  { %308 = dma.done.wait [#allocation4], 256  }
 0x251   :  { %309 = vsyncadd [#allocation4], 4294967040 }
 0x252   :  { %230 = vsyncpa [#allocation3], 1 }
 0x253   :  { %231 = vsyncpa [#allocation4], 1 }

</bundles_post_ra>
